<compile_context>
chip_gen: v5e
topology: v5e:2x2
jax: 0.10.0
libtpu: 0.0.40
codegen_flags: <defaults>
</compile_context>

<pallas_src>
import jax
import jax.numpy as jnp
from jax.experimental import pallas as pl
from jax.experimental.pallas import tpu as pltpu

BN_EPS = 1e-5
LANE = 128         # lane width: every feature dim is padded to a multiple
SUBLANE = 8        # sublane width for the packed bias array / batch tiling
DEFAULT_TM = 512   # batch row tile (safe for v5e/v6e/v7x VMEM budgets)


def _round_up(n, m):
    return ((n + m - 1) // m) * m


def _pad2(a, rows, cols):
    return jnp.pad(a, ((0, rows - a.shape[0]), (0, cols - a.shape[1])))


# --------------------------------------------------------------------------- #
# Kernel: one batch tile; all three (padded, bf16) weights resident in VMEM.  #
# --------------------------------------------------------------------------- #
def mlp_kernel(x_ref, w1_ref, w2_ref, w3_ref, b_ref, out_ref):
    h_p = w1_ref.shape[1]          # padded hidden width (static)
    o_p = w3_ref.shape[1]          # padded output width (static)

    x = x_ref[...].astype(jnp.bfloat16)                       # [TM, d_in_p]

    # fc1 (BN already folded into w1/b1 by the wrapper) + ReLU
    h = jnp.dot(x, w1_ref[...], preferred_element_type=jnp.float32)
    h = jnp.maximum(h + b_ref[0:1, :h_p], 0.0)                 # f32 epilogue

    # fc2 + ReLU
    h = jnp.dot(h.astype(jnp.bfloat16), w2_ref[...],
                preferred_element_type=jnp.float32)
    h = jnp.maximum(h + b_ref[1:2, :h_p], 0.0)

    # fc3 (no activation) -> lane-dense 128-multiple-wide store
    o = jnp.dot(h.astype(jnp.bfloat16), w3_ref[...],
                preferred_element_type=jnp.float32)
    out_ref[...] = (o + b_ref[2:3, :o_p]).astype(out_ref.dtype)


# --------------------------------------------------------------------------- #
# Wrapper                                                                     #
# --------------------------------------------------------------------------- #
def mlp_forward(x, params, *, tm=DEFAULT_TM):
    """x: [B, input_dim] float32. params: dict of arrays (see init_params)."""
    B, d_in = x.shape
    hidden = params["w1"].shape[1]
    d_out = params["w3"].shape[1]

    d_in_p = _round_up(d_in, LANE)
    h_p = _round_up(hidden, LANE)
    o_p = _round_up(d_out, LANE)
    b_cols = max(h_p, o_p)

    # ---- wrapper-side prep (plain XLA ops, executed outside the kernel) ----
    # Fold eval-mode BatchNorm1d into fc1:
    #   ((x - mu) * g / sqrt(v + eps) + b) @ W1 + b1
    #     = x @ (scale[:, None] * W1) + (b1 + shift @ W1)
    inv_std = jax.lax.rsqrt(params["bn_var"] + BN_EPS)        # [d_in]
    scale = params["bn_w"] * inv_std                          # [d_in]
    shift = params["bn_b"] - params["bn_mean"] * scale        # [d_in]
    w1f = scale[:, None] * params["w1"]                       # [d_in, hidden]
    b1f = params["b1"] + shift @ params["w1"]                 # [hidden]

    # Zero-pad feature dims to lane multiples; weights to bf16 (f32 accum).
    w1p = _pad2(w1f, d_in_p, h_p).astype(jnp.bfloat16)
    w2p = _pad2(params["w2"], h_p, h_p).astype(jnp.bfloat16)
    w3p = _pad2(params["w3"], h_p, o_p).astype(jnp.bfloat16)

    # Pack the three biases into a single sublane-aligned f32 array (one DMA).
    biases = jnp.zeros((SUBLANE, b_cols), jnp.float32)
    biases = biases.at[0, :hidden].set(b1f)
    biases = biases.at[1, :hidden].set(params["b2"])
    biases = biases.at[2, :d_out].set(params["b3"])

    # Batch tiling: round the tile to the sublane width and pad the batch so
    # the grid divides it evenly (padded rows are sliced off afterwards).
    tm_eff = min(tm, _round_up(B, SUBLANE))
    b_pad = _round_up(B, tm_eff)
    xp = jnp.pad(x, ((0, b_pad - B), (0, d_in_p - d_in)))

    out_padded = pl.pallas_call(
        mlp_kernel,
        out_shape=jax.ShapeDtypeStruct((b_pad, o_p), jnp.float32),
        grid=(b_pad // tm_eff,),
        in_specs=[
            pl.BlockSpec((tm_eff, d_in_p), lambda i: (i, 0)),  # x tile (pipelined)
            pl.BlockSpec((d_in_p, h_p), lambda i: (0, 0)),     # w1 (resident)
            pl.BlockSpec((h_p, h_p), lambda i: (0, 0)),        # w2 (resident)
            pl.BlockSpec((h_p, o_p), lambda i: (0, 0)),        # w3 (resident)
            pl.BlockSpec((SUBLANE, b_cols), lambda i: (0, 0)), # packed biases
        ],
        out_specs=pl.BlockSpec((tm_eff, o_p), lambda i: (i, 0)),
        compiler_params=pltpu.CompilerParams(
            dimension_semantics=("parallel",),                 # megacore on v7x
            vmem_limit_bytes=64 * 1024 * 1024,
        ),
    )(xp, w1p, w2p, w3p, biases)

    return out_padded[:B, :d_out]


# --------------------------------------------------------------------------- #
# Parameters / references                                                     #
# --------------------------------------------------------------------------- #
def init_params(key, input_dim, output_dim, hidden):
    """Synthetic parameters matching the PyTorch module's shapes.

    Linear weights are stored already transposed to [in, out]; biases and BN
    vectors are stored as 1-D [dim] arrays.
    """
    ks = jax.random.split(key, 6)

    def linear(kw, kb, fan_in, fan_out):
        bound = 1.0 / jnp.sqrt(fan_in)
        w = jax.random.uniform(kw, (fan_in, fan_out), jnp.float32, -bound, bound)
        b = jax.random.uniform(kb, (fan_out,), jnp.float32, -bound, bound)
        return w, b

    w1, b1 = linear(ks[0], ks[1], input_dim, hidden)
    w2, b2 = linear(ks[2], ks[3], hidden, hidden)
    w3, b3 = linear(ks[4], ks[5], hidden, output_dim)

    return {
        # BatchNorm1d: weight.fill_(1), bias.fill_(0); buffers at defaults.
        "bn_w": jnp.ones((input_dim,), jnp.float32),
        "bn_b": jnp.zeros((input_dim,), jnp.float32),
        "bn_mean": jnp.zeros((input_dim,), jnp.float32),
        "bn_var": jnp.ones((input_dim,), jnp.float32),
        "w1": w1, "b1": b1,
        "w2": w2, "b2": b2,
        "w3": w3, "b3": b3,
    }


def mlp_reference_f32(x, params):
    """Pure-f32 JAX reference of the PyTorch forward pass (eval-mode BN)."""
    inv_std = jax.lax.rsqrt(params["bn_var"] + BN_EPS)
    xn = (x - params["bn_mean"]) * inv_std * params["bn_w"] + params["bn_b"]
    h = jnp.maximum(xn @ params["w1"] + params["b1"], 0.0)
    h = jnp.maximum(h @ params["w2"] + params["b2"], 0.0)
    return h @ params["w3"] + params["b3"]


def mlp_reference_bf16(x, params):
    """Reference with the same bf16-input / f32-accumulate math as the kernel."""
    inv_std = jax.lax.rsqrt(params["bn_var"] + BN_EPS)
    scale = params["bn_w"] * inv_std
    shift = params["bn_b"] - params["bn_mean"] * scale
    w1f = scale[:, None] * params["w1"]
    b1f = params["b1"] + shift @ params["w1"]

    bf = lambda a: a.astype(jnp.bfloat16)
    h = jnp.maximum(
        jnp.dot(bf(x), bf(w1f), preferred_element_type=jnp.float32) + b1f, 0.0)
    h = jnp.maximum(
        jnp.dot(bf(h), bf(params["w2"]), preferred_element_type=jnp.float32)
        + params["b2"], 0.0)
    return (jnp.dot(bf(h), bf(params["w3"]), preferred_element_type=jnp.float32)
            + params["b3"])


if __name__ == "__main__":
    B, INPUT_DIM, HIDDEN, OUTPUT_DIM = 2, 16, 32, 8

    key = jax.random.PRNGKey(0)
    kx, kp = jax.random.split(key)
    x = jax.random.normal(kx, (B, INPUT_DIM), jnp.float32)
    params = init_params(kp, INPUT_DIM, OUTPUT_DIM, HIDDEN)

    fwd = jax.jit(mlp_forward)
    out = jax.block_until_ready(fwd(x, params))
    assert out.shape == (B, OUTPUT_DIM)

    # Tight check against a reference using identical bf16-input math.
    ref_q = mlp_reference_bf16(x, params)
    assert jnp.allclose(out, ref_q, atol=2e-3, rtol=2e-3), "bf16-ref mismatch"

    # Loose check against the pure-f32 PyTorch-equivalent forward pass.
    ref_f = mlp_reference_f32(x, params)
    assert jnp.allclose(out, ref_f, atol=5e-2, rtol=5e-2), "f32-ref mismatch"

    print("KERNEL_OK")
</pallas_src>

<mosaic_0001>
module attributes {stable_mosaic.version = 11 : i64} {
  func.func @mlp_kernel(%arg0: i32, %arg1: memref<8x128xf32, #tpu.memory_space<vmem>>, %arg2: memref<128x128xbf16, #tpu.memory_space<vmem>>, %arg3: memref<128x128xbf16, #tpu.memory_space<vmem>>, %arg4: memref<128x128xbf16, #tpu.memory_space<vmem>>, %arg5: memref<8x128xf32, #tpu.memory_space<vmem>>, %arg6: memref<8x128xf32, #tpu.memory_space<vmem>>) attributes {dimension_semantics = [#tpu.dimension_semantics<parallel>], iteration_bounds = array<i64: 1>, scalar_prefetch = 0 : i64, scratch_operands = 0 : i64, tpu.core_type = #tpu.core_type<tc>, window_params = [{transform_indices = @transform_0, window_bounds = array<i64: 8, 128>}, {pipeline_mode = #tpu.pipeline_mode<synchronous>, transform_indices = @transform_1, window_bounds = array<i64: 128, 128>}, {pipeline_mode = #tpu.pipeline_mode<synchronous>, transform_indices = @transform_2, window_bounds = array<i64: 128, 128>}, {pipeline_mode = #tpu.pipeline_mode<synchronous>, transform_indices = @transform_3, window_bounds = array<i64: 128, 128>}, {pipeline_mode = #tpu.pipeline_mode<synchronous>, transform_indices = @transform_4, window_bounds = array<i64: 8, 128>}, {transform_indices = @transform_5, window_bounds = array<i64: 8, 128>}]} {
    %c0 = arith.constant 0 : index
    %c0_0 = arith.constant 0 : index
    %0 = vector.load %arg1[%c0, %c0_0] : memref<8x128xf32, #tpu.memory_space<vmem>>, vector<8x128xf32>
    %1 = arith.truncf %0 : vector<8x128xf32> to vector<8x128xbf16>
    %c0_1 = arith.constant 0 : index
    %c0_2 = arith.constant 0 : index
    %2 = vector.load %arg2[%c0_1, %c0_2] : memref<128x128xbf16, #tpu.memory_space<vmem>>, vector<128x128xbf16>
    %cst = arith.constant dense<0.000000e+00> : vector<8x128xf32>
    %3 = tpu.matmul %1, %2, %cst {dimension_numbers = #tpu.dot_dimension_numbers<[1], [0], [0], [1], [0, 0, 1, 1], [], []>} : vector<8x128xbf16>, vector<128x128xbf16>, vector<8x128xf32> -> vector<8x128xf32>
    %c0_3 = arith.constant 0 : index
    %c0_4 = arith.constant 0 : index
    %4 = vector.load %arg5[%c0_3, %c0_4] : memref<8x128xf32, #tpu.memory_space<vmem>>, vector<1x128xf32>
    %5 = vector.broadcast %4 : vector<1x128xf32> to vector<8x128xf32>
    %6 = arith.addf %3, %5 : vector<8x128xf32>
    %cst_5 = arith.constant 0.000000e+00 : f32
    %7 = vector.broadcast %cst_5 : f32 to vector<8x128xf32>
    %8 = arith.maximumf %6, %7 : vector<8x128xf32>
    %9 = arith.truncf %8 : vector<8x128xf32> to vector<8x128xbf16>
    %c0_6 = arith.constant 0 : index
    %c0_7 = arith.constant 0 : index
    %10 = vector.load %arg3[%c0_6, %c0_7] : memref<128x128xbf16, #tpu.memory_space<vmem>>, vector<128x128xbf16>
    %cst_8 = arith.constant dense<0.000000e+00> : vector<8x128xf32>
    %11 = tpu.matmul %9, %10, %cst_8 {dimension_numbers = #tpu.dot_dimension_numbers<[1], [0], [0], [1], [0, 0, 1, 1], [], []>} : vector<8x128xbf16>, vector<128x128xbf16>, vector<8x128xf32> -> vector<8x128xf32>
    %c1 = arith.constant 1 : index
    %c0_9 = arith.constant 0 : index
    %12 = vector.load %arg5[%c1, %c0_9] : memref<8x128xf32, #tpu.memory_space<vmem>>, vector<1x128xf32>
    %13 = vector.broadcast %12 : vector<1x128xf32> to vector<8x128xf32>
    %14 = arith.addf %11, %13 : vector<8x128xf32>
    %cst_10 = arith.constant 0.000000e+00 : f32
    %15 = vector.broadcast %cst_10 : f32 to vector<8x128xf32>
    %16 = arith.maximumf %14, %15 : vector<8x128xf32>
    %17 = arith.truncf %16 : vector<8x128xf32> to vector<8x128xbf16>
    %c0_11 = arith.constant 0 : index
    %c0_12 = arith.constant 0 : index
    %18 = vector.load %arg4[%c0_11, %c0_12] : memref<128x128xbf16, #tpu.memory_space<vmem>>, vector<128x128xbf16>
    %cst_13 = arith.constant dense<0.000000e+00> : vector<8x128xf32>
    %19 = tpu.matmul %17, %18, %cst_13 {dimension_numbers = #tpu.dot_dimension_numbers<[1], [0], [0], [1], [0, 0, 1, 1], [], []>} : vector<8x128xbf16>, vector<128x128xbf16>, vector<8x128xf32> -> vector<8x128xf32>
    %c2 = arith.constant 2 : index
    %c0_14 = arith.constant 0 : index
    %20 = vector.load %arg5[%c2, %c0_14] : memref<8x128xf32, #tpu.memory_space<vmem>>, vector<1x128xf32>
    %21 = vector.broadcast %20 : vector<1x128xf32> to vector<8x128xf32>
    %22 = arith.addf %19, %21 : vector<8x128xf32>
    %c0_15 = arith.constant 0 : index
    %c0_16 = arith.constant 0 : index
    %23 = vector.load %arg6[%c0_15, %c0_16] : memref<8x128xf32, #tpu.memory_space<vmem>>, vector<8x128xf32>
    tpu.vector_store %arg6[%c0_15, %c0_16], %22 {strides = array<i32>} : memref<8x128xf32, #tpu.memory_space<vmem>>, vector<8x128xf32>,
    return
  }
  func.func @transform_0(%arg0: i32) -> (i32, i32) {
    %c0_i32 = arith.constant 0 : i32
    %c0_i32_0 = arith.constant 0 : i32
    return %arg0, %c0_i32 : i32, i32
  }
  func.func @transform_1(%arg0: i32) -> (i32, i32) {
    %c0_i32 = arith.constant 0 : i32
    %c0_i32_0 = arith.constant 0 : i32
    %c0_i32_1 = arith.constant 0 : i32
    return %c0_i32, %c0_i32_0 : i32, i32
  }
  func.func @transform_2(%arg0: i32) -> (i32, i32) {
    %c0_i32 = arith.constant 0 : i32
    %c0_i32_0 = arith.constant 0 : i32
    %c0_i32_1 = arith.constant 0 : i32
    return %c0_i32, %c0_i32_0 : i32, i32
  }
  func.func @transform_3(%arg0: i32) -> (i32, i32) {
    %c0_i32 = arith.constant 0 : i32
    %c0_i32_0 = arith.constant 0 : i32
    %c0_i32_1 = arith.constant 0 : i32
    return %c0_i32, %c0_i32_0 : i32, i32
  }
  func.func @transform_4(%arg0: i32) -> (i32, i32) {
    %c0_i32 = arith.constant 0 : i32
    %c0_i32_0 = arith.constant 0 : i32
    %c0_i32_1 = arith.constant 0 : i32
    return %c0_i32, %c0_i32_0 : i32, i32
  }
  func.func @transform_5(%arg0: i32) -> (i32, i32) {
    %c0_i32 = arith.constant 0 : i32
    %c0_i32_0 = arith.constant 0 : i32
    return %arg0, %c0_i32 : i32, i32
  }
}

</mosaic_0001>

<bundles_post_ra>
// kernel: mlp_forward.1
= control target key start
LH: loop header
LB: loop body
LE: loop exit
PB: predicated region body
PF: predicated region fallthrough
CT: control target
= control target key end

     0   :  { %s508_s1 = inlined_call_operand.vmem [shape: bf16[128,128], index: 1, kind: input, shape index: {}]   ;;  %s509_s2 = inlined_call_operand.vmem [shape: bf16[128,128], index: 2, kind: input, shape index: {}]   ;;  %s510_s4 = inlined_call_operand.vmem [shape: f32[8,128], index: 4, kind: input, shape index: {}]   ;;  %s511_s0 = inlined_call_operand.vmem [shape: f32[8,128], index: 0, kind: input, shape index: {}]   ;;  %s512_s3 = inlined_call_operand.vmem [shape: bf16[128,128], index: 3, kind: input, shape index: {}]   ;;  %s513_s5 = inlined_call_operand.vmem [shape: f32[8,128], index: 5, kind: output, shape index: {}]  }
   0x1   :  { %v371_v0 = vld [vmem:[%s508_s1 + $0x38] sm:$0xff]  ;;  %v370_v1 = vld [vmem:[%s508_s1 + $0x30] sm:$0xff]  ;;  %v369_v4 = vld [vmem:[%s508_s1 + $0x28] sm:$0xff] }
   0x2   :  { %88 = vmatpush.bf16.msra.mxu0 %v371_v0  ;;  %v379_v2 = vld [vmem:[%s509_s2 + $0x38] sm:$0xff]  ;;  %v378_v3 = vld [vmem:[%s509_s2 + $0x30] sm:$0xff]  ;;  %v377_v5 = vld [vmem:[%s509_s2 + $0x28] sm:$0xff] }
   0x3   :  { %169 = vmatpush.bf16.msra.mxu1 %v379_v2  ;;  %v368_v6 = vld [vmem:[%s508_s1 + $0x20] sm:$0xff]  ;;  %v367_v8 = vld [vmem:[%s508_s1 + $0x18] sm:$0xff]  ;;  %v366_v10 = vld [vmem:[%s508_s1 + $0x10] sm:$0xff] }
   0x4   :  { %v376_v7 = vld [vmem:[%s509_s2 + $0x20] sm:$0xff]  ;;  %v375_v9 = vld [vmem:[%s509_s2 + $0x18] sm:$0xff]  ;;  %v374_v11 = vld [vmem:[%s509_s2 + $0x10] sm:$0xff] }
   0x5   :  { %v365_v12 = vld [vmem:[%s508_s1 + $0x8] sm:$0xff]  ;;  %v364_v13 = vld [vmem:[%s508_s1] sm:$0xff]  ;;  %v387_v18 = vld [vmem:[%s512_s3 + $0x38] sm:$0xff] }
   0x6   :  { %89 = vmatpush.bf16.msra.mxu0 %v370_v1  ;;  %v20_v14 = vld [vmem:[%s511_s0] sm:$0xff]  ;;  %v373_v16 = vld [vmem:[%s509_s2 + $0x8] sm:$0xff]  ;;  %250 = vmatpush.bf16.msra.mxu2 %v387_v18  ;;  %v386_v19 = vld [vmem:[%s512_s3 + $0x30] sm:$0xff] }
   0x7   :  { %170 = vmatpush.bf16.msra.mxu1 %v378_v3  ;;  %v21_v15 = vpack.c.bf16 %v20_v14, %v20_v14  ;;  %v372_v17 = vld [vmem:[%s509_s2] sm:$0xff]  ;;  %v385_v20 = vld [vmem:[%s512_s3 + $0x28] sm:$0xff]  ;;  %v383_v22 = vld [vmem:[%s512_s3 + $0x18] sm:$0xff] }
   0x8   :  { %v384_v21 = vld [vmem:[%s512_s3 + $0x20] sm:$0xff]  ;;  %v382_v23 = vld [vmem:[%s512_s3 + $0x10] sm:$0xff]  ;;  %v381_v30 = vld [vmem:[%s512_s3 + $0x8] sm:$0xff] }
   0x9   :  { %v388_v24 = vld [vmem:[%s510_s4] ss:$0 sm:$0xff]  ;;  %v389_v32 = vld [vmem:[%s510_s4 + $0x1] ss:$0 sm:$0xff]  ;;  %v390_v38 = vld [vmem:[%s510_s4 + $0x2] ss:$0 sm:$0xff] }
   0xa   :  { %90 = vmatpush.bf16.msra.mxu0 %v369_v4  ;;  %251 = vmatpush.bf16.msra.mxu2 %v386_v19  ;;  %v380_v31 = vld [vmem:[%s512_s3] sm:$0xff] }
   0xb   :  { %171 = vmatpush.bf16.msra.mxu1 %v377_v5 }
   0xe   :  { %91 = vmatpush.bf16.msra.mxu0 %v368_v6  ;;  %252 = vmatpush.bf16.msra.mxu2 %v385_v20 }
   0xf   :  { %172 = vmatpush.bf16.msra.mxu1 %v376_v7 }
  0x12   :  { %92 = vmatpush.bf16.msra.mxu0 %v367_v8  ;;  %253 = vmatpush.bf16.msra.mxu2 %v384_v21 }
  0x13   :  { %173 = vmatpush.bf16.msra.mxu1 %v375_v9 }
  0x16   :  { %93 = vmatpush.bf16.msra.mxu0 %v366_v10  ;;  %254 = vmatpush.bf16.msra.mxu2 %v383_v22 }
  0x17   :  { %174 = vmatpush.bf16.msra.mxu1 %v374_v11 }
  0x1a   :  { %94 = vmatpush.bf16.msra.mxu0 %v365_v12  ;;  %255 = vmatpush.bf16.msra.mxu2 %v382_v23 }
  0x1b   :  { %175 = vmatpush.bf16.msra.mxu1 %v373_v16 }
  0x1e   :  { %95 = vmatpush.bf16.msra.mxu0 %v364_v13  ;;  %256 = vmatpush.bf16.msra.mxu2 %v381_v30 }
  0x1f   :  { %176 = vmatpush.bf16.msra.mxu1 %v372_v17 }
  0x21   :  { %96 = vmatmul.bf16.vlgmr.msra.gmra.mxu0 %v21_v15 }
  0x22   :  { %257 = vmatpush.bf16.msra.mxu2 %v380_v31 }
  0x9e   :  { %v97_v25 = vpop.f32.mrf.mxu0 }
  0x9f   :  { %v98_v26 = vadd.f32 %v388_v24, %v97_v25 }
  0xa1   :  { %v101_v27 = vmax.f32 %v98_v26, 0.0 }
  0xa3   :  { %v102_v28 = vpack.c.bf16 %v101_v27, %v101_v27 }
  0xa5   :  { %177 = vmatmul.bf16.vlgmr.msra.gmra.mxu1 %v102_v28 }
  0xa6   :  { %v99_v29 = vpop.f32.mrf.mxu0 }
 0x122   :  { %v178_v33 = vpop.f32.mrf.mxu1 }
 0x123   :  { %v179_v34 = vadd.f32 %v389_v32, %v178_v33 }
 0x125   :  { %v182_v35 = vmax.f32 %v179_v34, 0.0 }
 0x127   :  { %v183_v36 = vpack.c.bf16 %v182_v35, %v182_v35 }
 0x129   :  { %258 = vmatmul.bf16.vlgmr.msra.gmra.mxu2 %v183_v36 }
 0x12a   :  { %v180_v37 = vpop.f32.mrf.mxu1 }
 0x1ac   :  { %v259_v39 = vpop.f32.mrf.mxu2 }
 0x1ad   :  { %v260_v40 = vadd.f32 %v390_v38, %v259_v39 }
 0x1af   :  { %263 = vst [vmem:[%s513_s5] sm:$0xff] %v260_v40 }
 0x1b4   :  { %v261_v41 = vpop.f32.mrf.mxu2 }

</bundles_post_ra>
